<compile_context>
chip_gen: v7x
topology: tpu7x:2x2x1
jax: 0.10.0
libtpu: 0.0.40
codegen_flags: <defaults>
</compile_context>

<pallas_src>
import jax
import jax.numpy as jnp
from jax.experimental import pallas as pl
from jax.experimental.pallas import tpu as pltpu


def type_encoding_kernel(x_ref, ids_ref, emb_ref, o_ref):
    # x_ref:   (TM, D)            input tile
    # ids_ref: (TM, 1)  int32     type id per row
    # emb_ref: (num_types, D)     full embedding table (resident every step)
    # o_ref:   (TM, D)            output tile
    x = x_ref[...]
    ids = ids_ref[...]                        # (TM, 1) int32
    emb = emb_ref[...]                        # (num_types, D)
    num_types = emb.shape[0]

    if num_types <= 8:
        # VPU select chain: start from row 0, overwrite where id == t.
        # (Out-of-range ids fall back to row 0; PyTorch would raise there.)
        emb_sel = jnp.broadcast_to(emb[0:1, :], x.shape)
        for t in range(1, num_types):
            emb_sel = jnp.where(ids == t, emb[t : t + 1, :], emb_sel)
    else:
        # Larger tables: one-hot (TM, num_types) @ (num_types, D) on the MXU.
        iota = jax.lax.broadcasted_iota(jnp.int32, (x.shape[0], num_types), 1)
        onehot = (iota == ids).astype(emb.dtype)
        emb_sel = jnp.dot(onehot, emb, preferred_element_type=jnp.float32)

    # Add directly in the input dtype (no f32 round trip needed for an add).
    o_ref[...] = (x + emb_sel.astype(x.dtype)).astype(o_ref.dtype)


def type_encoding(x, type_ids, embedding, *, tm=512):
    """x: (B, S, D) float; type_ids: (B, S) int; embedding: (num_types, D)."""
    B, S, D = x.shape
    N = B * S
    num_types = embedding.shape[0]
    itemsize = jnp.dtype(x.dtype).itemsize

    # dtype-aware sublane minimum (f32: 8, bf16: 16).
    sub = 16 if itemsize == 2 else 8

    # Cap the tile so one (tm, D) buffer stays <= ~2 MiB (double-buffered
    # x/out -> <= ~8 MiB of scoped VMEM).
    max_tile_bytes = 2 * 1024 * 1024
    while tm > sub and tm * D * itemsize > max_tile_bytes:
        tm //= 2
    tm = max(sub, (tm // sub) * sub)
    # Never use a tile larger than the (sublane-rounded) row count.
    tm = min(tm, pl.cdiv(N, sub) * sub)

    # Pad rows so the grid divides evenly; padded rows sliced off afterwards.
    n_pad = pl.cdiv(N, tm) * tm
    x2 = x.reshape(N, D)
    ids2 = type_ids.reshape(N, 1).astype(jnp.int32)
    if n_pad != N:
        x2 = jnp.pad(x2, ((0, n_pad - N), (0, 0)))
        ids2 = jnp.pad(ids2, ((0, n_pad - N), (0, 0)))  # padded ids -> row 0 (harmless)

    cost = pl.CostEstimate(
        flops=N * D,  # one add per element
        transcendentals=0,
        bytes_accessed=2 * N * D * itemsize + N * 4 + num_types * D * itemsize,
    )

    out = pl.pallas_call(
        type_encoding_kernel,
        out_shape=jax.ShapeDtypeStruct((n_pad, D), x.dtype),
        grid_spec=pltpu.PrefetchScalarGridSpec(
            num_scalar_prefetch=0,
            grid=(n_pad // tm,),
            in_specs=[
                pl.BlockSpec((tm, D), lambda i: (i, 0)),          # x tile
                pl.BlockSpec((tm, 1), lambda i: (i, 0)),          # ids tile
                pl.BlockSpec((num_types, D), lambda i: (0, 0)),   # full table
            ],
            out_specs=pl.BlockSpec((tm, D), lambda i: (i, 0)),
        ),
        compiler_params=pltpu.CompilerParams(
            dimension_semantics=("parallel",)),
        cost_estimate=cost,
    )(x2, ids2, embedding)

    if n_pad != N:
        out = out[:N]
    return out.reshape(B, S, D)


if __name__ == "__main__":
    # Small shapes consistent with the module's forward:
    #   x: (batch=2, seq=8, d_model=128), type_ids: (2, 8) in {0, 1}
    batch, seq, d_model, num_types = 2, 8, 128, 2

    key = jax.random.PRNGKey(0)
    k_x, k_emb, k_ids = jax.random.split(key, 3)

    x = jax.random.normal(k_x, (batch, seq, d_model), dtype=jnp.float32)
    # nn.Embedding default init ~ N(0, 1)
    embedding = jax.random.normal(k_emb, (num_types, d_model), dtype=jnp.float32)
    type_ids = jax.random.randint(k_ids, (batch, seq), 0, num_types, dtype=jnp.int32)

    out = type_encoding(x, type_ids, embedding)
    out = jax.block_until_ready(out)

    # Reference check (plain JAX): x + embedding[type_ids]
    ref = x + embedding[type_ids]
    assert out.shape == ref.shape and out.dtype == ref.dtype
    assert jnp.allclose(out, ref, atol=1e-5, rtol=1e-5)

    print("KERNEL_OK")
</pallas_src>

<mosaic_0001>
module attributes {stable_mosaic.version = 11 : i64} {
  func.func @type_encoding_kernel(%arg0: i32, %arg1: memref<16x128xf32, #tpu.memory_space<vmem>>, %arg2: memref<16x1xi32, #tpu.memory_space<vmem>>, %arg3: memref<2x128xf32, #tpu.memory_space<vmem>>, %arg4: memref<16x128xf32, #tpu.memory_space<vmem>>) attributes {dimension_semantics = [#tpu.dimension_semantics<parallel>], iteration_bounds = array<i64: 1>, scalar_prefetch = 0 : i64, scratch_operands = 0 : i64, tpu.core_type = #tpu.core_type<tc>, window_params = [{transform_indices = @transform_0, window_bounds = array<i64: 16, 128>}, {transform_indices = @transform_1, window_bounds = array<i64: 16, 1>}, {pipeline_mode = #tpu.pipeline_mode<synchronous>, transform_indices = @transform_2, window_bounds = array<i64: 2, 128>}, {transform_indices = @transform_3, window_bounds = array<i64: 16, 128>}]} {
    %c0 = arith.constant 0 : index
    %c0_0 = arith.constant 0 : index
    %0 = vector.load %arg1[%c0, %c0_0] : memref<16x128xf32, #tpu.memory_space<vmem>>, vector<16x128xf32>
    %c0_1 = arith.constant 0 : index
    %c0_2 = arith.constant 0 : index
    %1 = vector.load %arg2[%c0_1, %c0_2] : memref<16x1xi32, #tpu.memory_space<vmem>>, vector<16x1xi32>
    %c0_3 = arith.constant 0 : index
    %c0_4 = arith.constant 0 : index
    %2 = vector.load %arg3[%c0_3, %c0_4] : memref<2x128xf32, #tpu.memory_space<vmem>>, vector<2x128xf32>
    %3 = vector.extract_strided_slice %2 {offsets = [0, 0], sizes = [1, 128], strides = [1, 1]} : vector<2x128xf32> to vector<1x128xf32>
    %4 = vector.shape_cast %3 : vector<1x128xf32> to vector<1x128xf32>
    %5 = vector.broadcast %4 : vector<1x128xf32> to vector<16x128xf32>
    %c1_i32 = arith.constant 1 : i32
    %6 = vector.broadcast %c1_i32 : i32 to vector<16x1xi32>
    %7 = arith.cmpi eq, %1, %6 : vector<16x1xi32>
    %8 = vector.extract_strided_slice %2 {offsets = [1, 0], sizes = [1, 128], strides = [1, 1]} : vector<2x128xf32> to vector<1x128xf32>
    %9 = vector.shape_cast %7 : vector<16x1xi1> to vector<16x1xi1>
    %10 = vector.broadcast %9 : vector<16x1xi1> to vector<16x128xi1>
    %11 = vector.shape_cast %8 : vector<1x128xf32> to vector<1x128xf32>
    %12 = vector.broadcast %11 : vector<1x128xf32> to vector<16x128xf32>
    %13 = arith.select %10, %12, %5 : vector<16x128xi1>, vector<16x128xf32>
    %14 = arith.addf %0, %13 : vector<16x128xf32>
    %c0_5 = arith.constant 0 : index
    %c0_6 = arith.constant 0 : index
    %15 = vector.load %arg4[%c0_5, %c0_6] : memref<16x128xf32, #tpu.memory_space<vmem>>, vector<16x128xf32>
    tpu.vector_store %arg4[%c0_5, %c0_6], %14 {strides = array<i32>} : memref<16x128xf32, #tpu.memory_space<vmem>>, vector<16x128xf32>,
    return
  }
  func.func @transform_0(%arg0: i32) -> (i32, i32) {
    %c0_i32 = arith.constant 0 : i32
    %c0_i32_0 = arith.constant 0 : i32
    return %arg0, %c0_i32 : i32, i32
  }
  func.func @transform_1(%arg0: i32) -> (i32, i32) {
    %c0_i32 = arith.constant 0 : i32
    %c0_i32_0 = arith.constant 0 : i32
    return %arg0, %c0_i32 : i32, i32
  }
  func.func @transform_2(%arg0: i32) -> (i32, i32) {
    %c0_i32 = arith.constant 0 : i32
    %c0_i32_0 = arith.constant 0 : i32
    %c0_i32_1 = arith.constant 0 : i32
    return %c0_i32, %c0_i32_0 : i32, i32
  }
  func.func @transform_3(%arg0: i32) -> (i32, i32) {
    %c0_i32 = arith.constant 0 : i32
    %c0_i32_0 = arith.constant 0 : i32
    return %arg0, %c0_i32 : i32, i32
  }
}

</mosaic_0001>

<bundles_post_ra>
// kernel: tpu_custom_call.1
= control target key start
LH: loop header
LB: loop body
LE: loop exit
PB: predicated region body
PF: predicated region fallthrough
CT: control target
= control target key end

     0   :  { %v91_v2 = vmov 0   ;;  %s142_s0 = inlined_call_operand.vmem [shape: f32[16,128], index: 0, kind: input, shape index: {}]   ;;  %s143_s1 = inlined_call_operand.vmem [shape: s32[16,1], index: 1, kind: input, shape index: {}]   ;;  %s144_s2 = inlined_call_operand.vmem [shape: f32[2,128], index: 2, kind: input, shape index: {}]   ;;  %s145_s3 = inlined_call_operand.hbm [shape: f32[16,128], index: 3, kind: output, shape index: {}]  }
   0x1   :  { %v17_v0 = vld [vmem:[%s143_s1] sm:$0xff]  ;;  %v18_v1 = vld [vmem:[%s143_s1 + $0x8] sm:$0xff]  ;;  %66 = vset.pattern.permute.xlu0 %v91_v2 }
   0x2   :  { %vm24_vm0 = vcmp.eq.s32.totalorder %v17_v0, 1  ;;  %vm25_vm1 = vcmp.eq.s32.totalorder %v18_v1, 1 }
   0x3   :  { %8 = vsyncpa [#allocation3], 0  ;;  %v26_v3 = vsel %vm24_vm0, 1, %v91_v2  ;;  %v27_v4 = vsel %vm25_vm1, 1, %v91_v2  ;;  %v20_v5 = vlaneseq  ;;  %v19_v9 = vld [vmem:[%s144_s2] sm:$0x3] }
   0x4   :  { %29 = vperm.xlu0 %66, %v26_v3   ;;  %v15_v13 = vld [vmem:[%s142_s0] sm:$0xff]  ;;  %s92_s19 = smov [#allocation2]   ;;  %v16_v17 = vld [vmem:[%s142_s0 + $0x8] sm:$0xff] }
   0x5   :  { %v21_v6 = vshrl.u32 %v20_v5, 7  ;;  %s51_s20 = sshll.u32 %s92_s19, 4  ;;  %s52_s20 = int_to_ptr.vmem [resolvable:$true] %s51_s20 }
   0x6   :  { %s67_s2 = scalar_lea.vmem %s52_s20, 256  ;;  %p72_p1 = scmp.lt.s32.totalorder %s52_s20, %s52_s20 }
   0x7   :  { %v22_v7 = vsub.s32 0, %v21_v6  ;;  %v38_v8 = vsub.s32 1, %v21_v6  ;;  %p68_p0 = scmp.ne.s32.totalorder %s52_s20, %s67_s2  ;;  %p73_p2 = scmp.lt.s32.totalorder %s67_s2, %s67_s2 }
   0x8   :  { %32 = vperm.xlu0 %66, %v27_v4  }
   0x9   :  { %v23_v10 = vrot.slane %v19_v9, %v22_v7  ;;  %v39_v11 = vrot.slane %v19_v9, %v38_v8  ;;  %p74_p3 = por %p73_p2, %p72_p1 }
   0xb   :  { %p75_p4 = pnand %p74_p3, %p68_p0 }
  0x83   :  { %v30_v12 = vpop.permute.xlu0 %29 }
  0x84   :  { %vm34_vm2 = vcmp.eq.s32.totalorder %v30_v12, 1 }
  0x85   :  { %v40_v14 = vsel %vm34_vm2, %v39_v11, %v23_v10 }
  0x86   :  { %v42_v15 = vadd.f32 %v40_v14, %v15_v13 }
  0x87   :  { %v33_v16 = vpop.permute.xlu0 %32 }
  0x88   :  { %44 = vst [vmem:[#allocation2] sm:$0xff] %v42_v15  ;;  %vm35_vm3 = vcmp.eq.s32.totalorder %v33_v16, 1 }
  0x89   :  { %v41_v18 = vsel %vm35_vm3, %v39_v11, %v23_v10 }
  0x8a   :  { %v43_v19 = vadd.f32 %v41_v18, %v16_v17 }
  0x8c   :  { %45 = vst [vmem:[#allocation2 + $0x8] sm:$0xff] %v43_v19 }
  0x8d   :  { %78 = shalt.err (!%p75_p4)
}
  0x8e   :  { %s79_s25 = scalar_lea.hbm %s145_s3, 256 }
  0x8f   :  { %p80_p5 = scmp.ne.s32.totalorder %s145_s3, %s79_s25  ;;  %p83_p6 = scmp.lt.u32.totalorder %s79_s25, %s145_s3 }
  0x91   :  { %p85_p7 = pnand %p83_p6, %p80_p5 }
  0x93   :  { %88 = shalt.err (!%p85_p7)
}
  0x94   :  { %s93_s29 = smov 128   ;;  %s94_s30 = smov 8  }
  0x95   :  { %57 = dma.vmem_to_hbm [thread:$0]  %s52_s20, 256, %s145_s3, [#allocation3], %s93_s29, %s93_s29, %s94_s30  }
  0x96   :  { %89 = dma.done.wait [#allocation3], 256  }
  0x97   :  { %90 = vsyncadd [#allocation3], 4294967040 }
  0x98   :  { %61 = vsyncpa [#allocation3], 1 }

</bundles_post_ra>
